<compile_context>
chip_gen: v5e
topology: v5e:2x2
jax: 0.10.0
libtpu: 0.0.40
codegen_flags: <defaults>
</compile_context>

<pallas_src>
import jax
import jax.numpy as jnp
from jax.experimental import pallas as pl
from jax.experimental.pallas import tpu as pltpu


# --------------------------------------------------------------------------
# Kernels
# --------------------------------------------------------------------------
def _attention_kernel(x_ref, wqkv_ref, wout_ref, bias_ref, o_ref):
    """General sequence length; processes one batch element per grid step.

    x_ref:    (1, N, C)               transposed input slab (lane dim = C)
    wqkv_ref: (3, heads, C, d)        [Wq*scale, Wk, Wv], per-head, input-major
    wout_ref: (heads, d, C_out)       per-head output projection
    bias_ref: (1, C_out)
    o_ref:    (1, N, C_out)
    """
    xt = x_ref[0]                                        # (N, C) f32
    heads = wqkv_ref.shape[1]
    n, c = xt.shape
    xb = jnp.broadcast_to(xt[None], (heads, n, c))       # replicate over heads

    q = jnp.einsum('hnc,hcd->hnd', xb, wqkv_ref[0],
                   preferred_element_type=jnp.float32)   # scale already folded
    k = jnp.einsum('hnc,hcd->hnd', xb, wqkv_ref[1],
                   preferred_element_type=jnp.float32)
    v = jnp.einsum('hnc,hcd->hnd', xb, wqkv_ref[2],
                   preferred_element_type=jnp.float32)

    sim = jnp.einsum('hnd,hmd->hnm', q, k,
                     preferred_element_type=jnp.float32)  # (heads, N, N)
    sim = sim - jnp.max(sim, axis=-1, keepdims=True)      # stable softmax
    p = jnp.exp(sim)
    attn = p * pl.reciprocal(jnp.sum(p, axis=-1, keepdims=True), approx=False)

    ov = jnp.einsum('hnm,hmd->hnd', attn, v,
                    preferred_element_type=jnp.float32)   # (heads, N, d)
    oc = jnp.einsum('hnd,hdc->hnc', ov, wout_ref[...],
                    preferred_element_type=jnp.float32)   # (heads, N, C_out)
    o_ref[0] = (jnp.sum(oc, axis=0) + bias_ref[...]).astype(o_ref.dtype)


def _fused_len1_kernel(x_ref, w_ref, b_ref, o_ref):
    """N == 1 fast path: softmax over one key is exactly 1, so the whole
    module is x @ (Wv^T @ Wout^T) + b — a single MXU matmul per tile."""
    o_ref[...] = (jnp.dot(x_ref[...], w_ref[...],
                          preferred_element_type=jnp.float32)
                  + b_ref[...]).astype(o_ref.dtype)


# --------------------------------------------------------------------------
# Wrapper
# --------------------------------------------------------------------------
def self_attention(x, w_qkv, w_out, b_out, *, heads, dim_head):
    """Pallas forward of SelfAttention.

    x:      (B, x_dim, N) float32
    w_qkv:  (3*heads*dim_head, x_dim)   -- Conv1d(k=1) weight, no bias
    w_out:  (x_dim, heads*dim_head)     -- Conv1d(k=1) weight
    b_out:  (x_dim,)                    -- Conv1d bias
    returns (B, x_dim, N) float32
    """
    B, C, N = x.shape
    H = heads * dim_head
    C_out = w_out.shape[0]
    scale = dim_head ** (-0.5)

    if N == 1:
        # --- fused single-matmul path (attention is a provable no-op) ------
        w_v = w_qkv[2 * H:]                              # (H, C)
        w_fused = w_v.T @ w_out.T                        # (C, C_out)
        bias = b_out.reshape(1, C_out)
        x_flat = x[:, :, 0]                              # (B, C)
        tb = min(B, 256)
        out_flat = pl.pallas_call(
            _fused_len1_kernel,
            out_shape=jax.ShapeDtypeStruct((B, C_out), jnp.float32),
            grid_spec=pltpu.PrefetchScalarGridSpec(
                num_scalar_prefetch=0,
                grid=(pl.cdiv(B, tb),),
                in_specs=[
                    pl.BlockSpec((tb, C), lambda i: (i, 0)),
                    pl.BlockSpec((C, C_out), lambda i: (0, 0)),
                    pl.BlockSpec((1, C_out), lambda i: (0, 0)),
                ],
                out_specs=pl.BlockSpec((tb, C_out), lambda i: (i, 0)),
            ),
            compiler_params=pltpu.CompilerParams(
                dimension_semantics=("parallel",)),
        )(x_flat, w_fused, bias)
        return out_flat[:, :, None]

    # --- general sequence-length path --------------------------------------
    wq = w_qkv[:H].reshape(heads, dim_head, C)
    wk = w_qkv[H:2 * H].reshape(heads, dim_head, C)
    wv = w_qkv[2 * H:].reshape(heads, dim_head, C)
    wqkv_r = jnp.stack([
        jnp.transpose(wq, (0, 2, 1)) * scale,            # fold q-scale in
        jnp.transpose(wk, (0, 2, 1)),
        jnp.transpose(wv, (0, 2, 1)),
    ])                                                   # (3, heads, C, d)
    wout_r = jnp.transpose(w_out.reshape(C_out, heads, dim_head), (1, 2, 0))
    bias = b_out.reshape(1, C_out)
    xt = jnp.transpose(x, (0, 2, 1))                     # (B, N, C)

    out_t = pl.pallas_call(
        _attention_kernel,
        out_shape=jax.ShapeDtypeStruct((B, N, C_out), jnp.float32),
        grid_spec=pltpu.PrefetchScalarGridSpec(
            num_scalar_prefetch=0,
            grid=(B,),
            in_specs=[
                pl.BlockSpec((1, N, C), lambda b: (b, 0, 0)),
                pl.BlockSpec((3, heads, C, dim_head), lambda b: (0, 0, 0, 0)),
                pl.BlockSpec((heads, dim_head, C_out), lambda b: (0, 0, 0)),
                pl.BlockSpec((1, C_out), lambda b: (0, 0)),
            ],
            out_specs=pl.BlockSpec((1, N, C_out), lambda b: (b, 0, 0)),
        ),
        compiler_params=pltpu.CompilerParams(
            dimension_semantics=("parallel",)),
    )(xt, wqkv_r, wout_r, bias)
    return jnp.transpose(out_t, (0, 2, 1))               # (B, C_out, N)


# --------------------------------------------------------------------------
# Pure-JAX mirror of the PyTorch forward (verification)
# --------------------------------------------------------------------------
def reference(x, w_qkv, w_out, b_out, *, heads, dim_head):
    B, C, N = x.shape
    H = heads * dim_head
    scale = dim_head ** (-0.5)
    qkv = jnp.einsum('oc,bcn->bon', w_qkv, x)            # Conv1d k=1, no bias
    q, k, v = qkv[:, :H], qkv[:, H:2 * H], qkv[:, 2 * H:]
    qh = q.reshape(B, heads, dim_head, N) * scale        # 'b (h c) n -> b h c n'
    kh = k.reshape(B, heads, dim_head, N)
    vh = v.reshape(B, heads, dim_head, N)
    sim = jnp.einsum('bhdi,bhdj->bhij', qh, kh)
    attn = jax.nn.softmax(sim, axis=-1)
    out = jnp.einsum('bhij,bhdj->bhid', attn, vh)        # (B, h, N, d)
    out = jnp.transpose(out, (0, 1, 3, 2)).reshape(B, H, N)   # 'b h n d->b (h d) n'
    return jnp.einsum('oc,bcn->bon', w_out, out) + b_out[None, :, None]


# --------------------------------------------------------------------------
if __name__ == "__main__":
    B, x_dim, N = 4, 128, 16
    heads, dim_head = 4, 32            # hidden = 128 -> lane-dense tiles
    hidden = heads * dim_head

    key = jax.random.PRNGKey(0)
    k1, k2, k3, k4, k5 = jax.random.split(key, 5)
    x = jax.random.normal(k1, (B, x_dim, N), jnp.float32)
    w_qkv = 0.1 * jax.random.normal(k2, (3 * hidden, x_dim), jnp.float32)
    w_out = 0.1 * jax.random.normal(k3, (x_dim, hidden), jnp.float32)
    b_out = 0.1 * jax.random.normal(k4, (x_dim,), jnp.float32)

    # General sequence length (real softmax attention over N keys).
    out = self_attention(x, w_qkv, w_out, b_out, heads=heads, dim_head=dim_head)
    out = jax.block_until_ready(out)
    ref = reference(x, w_qkv, w_out, b_out, heads=heads, dim_head=dim_head)
    assert out.shape == (B, x_dim, N)
    assert jnp.allclose(out, ref, atol=1e-4, rtol=1e-4), (
        f"general path max abs err {jnp.max(jnp.abs(out - ref))}")

    # Length-1 usage (x.unsqueeze(-1) in networks.py): fused single-matmul path.
    x1 = jax.random.normal(k5, (B, x_dim, 1), jnp.float32)
    out1 = self_attention(x1, w_qkv, w_out, b_out, heads=heads, dim_head=dim_head)
    out1 = jax.block_until_ready(out1)
    ref1 = reference(x1, w_qkv, w_out, b_out, heads=heads, dim_head=dim_head)
    assert out1.shape == (B, x_dim, 1)
    assert jnp.allclose(out1, ref1, atol=1e-4, rtol=1e-4), (
        f"fused path max abs err {jnp.max(jnp.abs(out1 - ref1))}")

    print("KERNEL_OK")
</pallas_src>

<mosaic_0001>
module attributes {stable_mosaic.version = 11 : i64} {
  func.func @_attention_kernel(%arg0: i32, %arg1: memref<1x16x128xf32, #tpu.memory_space<vmem>>, %arg2: memref<3x4x128x32xf32, #tpu.memory_space<vmem>>, %arg3: memref<4x32x128xf32, #tpu.memory_space<vmem>>, %arg4: memref<1x128xf32, #tpu.memory_space<vmem>>, %arg5: memref<1x16x128xf32, #tpu.memory_space<vmem>>) attributes {dimension_semantics = [#tpu.dimension_semantics<parallel>], iteration_bounds = array<i64: 4>, scalar_prefetch = 0 : i64, scratch_operands = 0 : i64, tpu.core_type = #tpu.core_type<tc>, window_params = [{transform_indices = @transform_0, window_bounds = array<i64: 1, 16, 128>}, {pipeline_mode = #tpu.pipeline_mode<synchronous>, transform_indices = @transform_1, window_bounds = array<i64: 3, 4, 128, 32>}, {pipeline_mode = #tpu.pipeline_mode<synchronous>, transform_indices = @transform_2, window_bounds = array<i64: 4, 32, 128>}, {pipeline_mode = #tpu.pipeline_mode<synchronous>, transform_indices = @transform_3, window_bounds = array<i64: 1, 128>}, {transform_indices = @transform_4, window_bounds = array<i64: 1, 16, 128>}]} {
    %c0 = arith.constant 0 : index
    %c0_0 = arith.constant 0 : index
    %c0_1 = arith.constant 0 : index
    %0 = vector.load %arg1[%c0, %c0_0, %c0_1] : memref<1x16x128xf32, #tpu.memory_space<vmem>>, vector<1x16x128xf32>
    %1 = vector.shape_cast %0 : vector<1x16x128xf32> to vector<16x128xf32>
    %2 = vector.shape_cast %1 : vector<16x128xf32> to vector<1x16x128xf32>
    %3 = vector.shape_cast %2 : vector<1x16x128xf32> to vector<1x16x128xf32>
    %4 = vector.broadcast %3 : vector<1x16x128xf32> to vector<4x16x128xf32>
    %c0_2 = arith.constant 0 : index
    %c0_3 = arith.constant 0 : index
    %c0_4 = arith.constant 0 : index
    %c0_5 = arith.constant 0 : index
    %5 = vector.load %arg2[%c0_2, %c0_3, %c0_4, %c0_5] : memref<3x4x128x32xf32, #tpu.memory_space<vmem>>, vector<1x4x128x32xf32>
    %6 = vector.shape_cast %5 : vector<1x4x128x32xf32> to vector<4x128x32xf32>
    "tpu.trace_start"() <{level = 10 : i32, message = "hnc,hcd->hnd"}> : () -> ()
    %cst = arith.constant dense<0.000000e+00> : vector<4x16x32xf32>
    %7 = tpu.matmul %4, %6, %cst {dimension_numbers = #tpu.dot_dimension_numbers<[2], [1], [1], [2], [0, 0, 0, 1, 1, 2], [0], [0]>} : vector<4x16x128xf32>, vector<4x128x32xf32>, vector<4x16x32xf32> -> vector<4x16x32xf32>
    "tpu.trace_stop"() : () -> ()
    %c1 = arith.constant 1 : index
    %c0_6 = arith.constant 0 : index
    %c0_7 = arith.constant 0 : index
    %c0_8 = arith.constant 0 : index
    %8 = vector.load %arg2[%c1, %c0_6, %c0_7, %c0_8] : memref<3x4x128x32xf32, #tpu.memory_space<vmem>>, vector<1x4x128x32xf32>
    %9 = vector.shape_cast %8 : vector<1x4x128x32xf32> to vector<4x128x32xf32>
    "tpu.trace_start"() <{level = 10 : i32, message = "hnc,hcd->hnd"}> : () -> ()
    %cst_9 = arith.constant dense<0.000000e+00> : vector<4x16x32xf32>
    %10 = tpu.matmul %4, %9, %cst_9 {dimension_numbers = #tpu.dot_dimension_numbers<[2], [1], [1], [2], [0, 0, 0, 1, 1, 2], [0], [0]>} : vector<4x16x128xf32>, vector<4x128x32xf32>, vector<4x16x32xf32> -> vector<4x16x32xf32>
    "tpu.trace_stop"() : () -> ()
    %c2 = arith.constant 2 : index
    %c0_10 = arith.constant 0 : index
    %c0_11 = arith.constant 0 : index
    %c0_12 = arith.constant 0 : index
    %11 = vector.load %arg2[%c2, %c0_10, %c0_11, %c0_12] : memref<3x4x128x32xf32, #tpu.memory_space<vmem>>, vector<1x4x128x32xf32>
    %12 = vector.shape_cast %11 : vector<1x4x128x32xf32> to vector<4x128x32xf32>
    "tpu.trace_start"() <{level = 10 : i32, message = "hnc,hcd->hnd"}> : () -> ()
    %cst_13 = arith.constant dense<0.000000e+00> : vector<4x16x32xf32>
    %13 = tpu.matmul %4, %12, %cst_13 {dimension_numbers = #tpu.dot_dimension_numbers<[2], [1], [1], [2], [0, 0, 0, 1, 1, 2], [0], [0]>} : vector<4x16x128xf32>, vector<4x128x32xf32>, vector<4x16x32xf32> -> vector<4x16x32xf32>
    "tpu.trace_stop"() : () -> ()
    "tpu.trace_start"() <{level = 10 : i32, message = "hnd,hmd->hnm"}> : () -> ()
    %cst_14 = arith.constant dense<0.000000e+00> : vector<4x16x16xf32>
    %14 = tpu.matmul %7, %10, %cst_14 {dimension_numbers = #tpu.dot_dimension_numbers<[2], [2], [1], [1], [0, 0, 0, 1, 1, 1], [0], [0]>} : vector<4x16x32xf32>, vector<4x16x32xf32>, vector<4x16x16xf32> -> vector<4x16x16xf32>
    "tpu.trace_stop"() : () -> ()
    %cst_15 = arith.constant dense<0xFF800000> : vector<4x16xf32>
    %15 = vector.multi_reduction <maximumf>, %14, %cst_15 [2] : vector<4x16x16xf32> to vector<4x16xf32>
    %16 = vector.shape_cast %15 : vector<4x16xf32> to vector<4x16x1xf32>
    %17 = vector.broadcast %16 : vector<4x16x1xf32> to vector<4x16x16xf32>
    %18 = arith.subf %14, %17 : vector<4x16x16xf32>
    %19 = math.exp %18 : vector<4x16x16xf32>
    %cst_16 = arith.constant dense<0.000000e+00> : vector<4x16xf32>
    %20 = vector.multi_reduction <add>, %19, %cst_16 [2] : vector<4x16x16xf32> to vector<4x16xf32>
    %21 = vector.shape_cast %20 : vector<4x16xf32> to vector<4x16x1xf32>
    %22 = tpu.reciprocal %21 : vector<4x16x1xf32> -> vector<4x16x1xf32>
    %23 = vector.broadcast %22 : vector<4x16x1xf32> to vector<4x16x16xf32>
    %24 = arith.mulf %19, %23 : vector<4x16x16xf32>
    "tpu.trace_start"() <{level = 10 : i32, message = "hnm,hmd->hnd"}> : () -> ()
    %cst_17 = arith.constant dense<0.000000e+00> : vector<4x16x32xf32>
    %25 = tpu.matmul %24, %13, %cst_17 {dimension_numbers = #tpu.dot_dimension_numbers<[2], [1], [1], [2], [0, 0, 0, 1, 1, 2], [0], [0]>} : vector<4x16x16xf32>, vector<4x16x32xf32>, vector<4x16x32xf32> -> vector<4x16x32xf32>
    "tpu.trace_stop"() : () -> ()
    %c0_18 = arith.constant 0 : index
    %c0_19 = arith.constant 0 : index
    %c0_20 = arith.constant 0 : index
    %26 = vector.load %arg3[%c0_18, %c0_19, %c0_20] : memref<4x32x128xf32, #tpu.memory_space<vmem>>, vector<4x32x128xf32>
    "tpu.trace_start"() <{level = 10 : i32, message = "hnd,hdc->hnc"}> : () -> ()
    %cst_21 = arith.constant dense<0.000000e+00> : vector<4x16x128xf32>
    %27 = tpu.matmul %25, %26, %cst_21 {dimension_numbers = #tpu.dot_dimension_numbers<[2], [1], [1], [2], [0, 0, 0, 1, 1, 2], [0], [0]>} : vector<4x16x32xf32>, vector<4x32x128xf32>, vector<4x16x128xf32> -> vector<4x16x128xf32>
    "tpu.trace_stop"() : () -> ()
    %cst_22 = arith.constant dense<0.000000e+00> : vector<16x128xf32>
    %28 = vector.multi_reduction <add>, %27, %cst_22 [0] : vector<4x16x128xf32> to vector<16x128xf32>
    %c0_23 = arith.constant 0 : index
    %c0_24 = arith.constant 0 : index
    %29 = vector.load %arg4[%c0_23, %c0_24] : memref<1x128xf32, #tpu.memory_space<vmem>>, vector<1x128xf32>
    %30 = vector.broadcast %29 : vector<1x128xf32> to vector<16x128xf32>
    %31 = arith.addf %28, %30 : vector<16x128xf32>
    %c0_25 = arith.constant 0 : index
    %c0_26 = arith.constant 0 : index
    %c0_27 = arith.constant 0 : index
    %32 = vector.load %arg5[%c0_25, %c0_26, %c0_27] : memref<1x16x128xf32, #tpu.memory_space<vmem>>, vector<1x16x128xf32>
    %33 = vector.shape_cast %32 : vector<1x16x128xf32> to vector<16x128xf32>
    %34 = vector.shape_cast %31 : vector<16x128xf32> to vector<1x16x128xf32>
    tpu.vector_store %arg5[%c0_25, %c0_26, %c0_27], %34 {strides = array<i32>} : memref<1x16x128xf32, #tpu.memory_space<vmem>>, vector<1x16x128xf32>,
    return
  }
  func.func @transform_0(%arg0: i32) -> (i32, i32, i32) {
    %c0_i32 = arith.constant 0 : i32
    %c0_i32_0 = arith.constant 0 : i32
    %c0_i32_1 = arith.constant 0 : i32
    return %arg0, %c0_i32, %c0_i32_0 : i32, i32, i32
  }
  func.func @transform_1(%arg0: i32) -> (i32, i32, i32, i32) {
    %c0_i32 = arith.constant 0 : i32
    %c0_i32_0 = arith.constant 0 : i32
    %c0_i32_1 = arith.constant 0 : i32
    %c0_i32_2 = arith.constant 0 : i32
    %c0_i32_3 = arith.constant 0 : i32
    return %c0_i32, %c0_i32_0, %c0_i32_1, %c0_i32_2 : i32, i32, i32, i32
  }
  func.func @transform_2(%arg0: i32) -> (i32, i32, i32) {
    %c0_i32 = arith.constant 0 : i32
    %c0_i32_0 = arith.constant 0 : i32
    %c0_i32_1 = arith.constant 0 : i32
    %c0_i32_2 = arith.constant 0 : i32
    return %c0_i32, %c0_i32_0, %c0_i32_1 : i32, i32, i32
  }
  func.func @transform_3(%arg0: i32) -> (i32, i32) {
    %c0_i32 = arith.constant 0 : i32
    %c0_i32_0 = arith.constant 0 : i32
    %c0_i32_1 = arith.constant 0 : i32
    return %c0_i32, %c0_i32_0 : i32, i32
  }
  func.func @transform_4(%arg0: i32) -> (i32, i32, i32) {
    %c0_i32 = arith.constant 0 : i32
    %c0_i32_0 = arith.constant 0 : i32
    %c0_i32_1 = arith.constant 0 : i32
    return %arg0, %c0_i32, %c0_i32_0 : i32, i32, i32
  }
}

</mosaic_0001>

<bundles_post_ra>
// kernel: tpu_custom_call.1
= control target key start
LH: loop header
LB: loop body
LE: loop exit
PB: predicated region body
PF: predicated region fallthrough
CT: control target
= control target key end

     0   :  { %9 = vsyncpa [#allocation3], 0  ;;  %s2617_s0 = inlined_call_operand.vmem [shape: f32[4,16,128], index: 0, kind: input, shape index: {}]   ;;  %s2618_s1 = inlined_call_operand.vmem [shape: f32[3,4,128,32], index: 1, kind: input, shape index: {}]   ;;  %s2619_s2 = inlined_call_operand.vmem [shape: f32[4,32,128], index: 2, kind: input, shape index: {}]   ;;  %s2620_s3 = inlined_call_operand.vmem [shape: f32[1,128], index: 3, kind: input, shape index: {}]   ;;  %s2621_s4 = inlined_call_operand.hbm [shape: f32[4,16,128], index: 4, kind: output, shape index: {}]  }
   0x1   :  { %11 = vsyncpa [#allocation3 + $0x1], 0  ;;  %s1681_s15 = smov 0   ;;  %s1683_s16 = smov 0  }
   0x2   :  { %s1685_s17 = smov 0   ;;  %s1687_s18 = smov 0  }
   0x3 LB: > { %s1702_s19 = sadd.s32 4294967295, %s1652_s18   ;;  %s1342_s20 = sadd.s32 4294967294, %s1652_s18   ;;  %s1652_s18 = sphi %s1687_s18, %s2641_s18   ;;  %s1648_s17 = sphi %s1685_s17, %s2640_s17   ;;  %s1644_s16 = sphi %s1683_s16, %s2639_s16   ;;  %s1640_s15 = sphi %s1681_s15, %s2638_s15  }
   0x4   : > { %s1706_s21 = sadd.s32 1, %s1652_s18   ;;  %s113_s22 = sadd.s32 1, %s1648_s17 }
   0x5   : > { %s110_s23 = ssub.s32 %s1652_s18, %s1706_s21  ;;  %p123_p0 = scmp.ne.s32.totalorder %s1648_s17, %s1644_s16 }
   0x6   : > { %p111_p1 = scmp.eq.s32.totalorder %s110_s23, 0  ;;  %p124_p2 = scmp.eq.s32.totalorder %s1702_s19, 3 }
   0x7   : > { %p129_p3 = scmp.ne.s32.totalorder %s1644_s16, %s1640_s15  ;;  %p130_p4 = scmp.eq.s32.totalorder %s1342_s20, 3 }
   0x8   : > { %s1717_s24 = scalar_select %p111_p1, %s1648_s17, %s113_s22  }
   0x9   : > { %p1719_p5 = por %p124_p2, %p123_p0  ;;  %p1723_p6 = por %p130_p4, %p129_p3 }
   0xa   : > { %p1345_p7 = scmp.ge.s32.totalorder %s1652_s18, 1  ;;  %p165_p8 = scmp.lt.s32.totalorder %s1652_s18, 5 }
   0xc   : > { %p166_p9 = pnand %p1345_p7, %p165_p8 }
   0xd   : > { %p191_p10 = scmp.lt.s32.totalorder (!%p166_p9), %s1702_s19, 3  ;;  %s188_s22 = sand.u32 (!%p166_p9), 1, %s1644_s16  }
   0xe   : > { %169 = sbr.rel (%p166_p9) target bundleno = 923 (0x39b), region = 36  ;;  %s1515_s29 = sshll.u32 (!%p166_p9), %s1702_s19, 4 }
   0xf   : > { %s1276_s9 = scalar_lea.hbm (!%p166_p9), %s2621_s4, %s1515_s29  ;;  %s1610_s14 = scalar_lea.hbm (!%p166_p9), %s2621_s4, 64 }
  0x10   : > { %s1279_s11 = sshll.u32 (!%p166_p9), %s1276_s9, 4  ;;  %s1280_s11 = int_to_ptr.hbm [resolvable:$true] %s1279_s11 }
  0x13   : > { %v213_v0 = vld [vmem:[%s2618_s1 + $0x78] sm:$0xff]  ;;  %v212_v4 = vld [vmem:[%s2618_s1 + $0x70] sm:$0xff]  ;;  %v211_v8 = vld [vmem:[%s2618_s1 + $0x68] sm:$0xff]  ;;  %s1967_s30 = scalar_select %p191_p10, %s1702_s19, 3  ;;  %vm668_vm0 = vcmask 261120   ;;  %vm809_vm1 = vcmask 130048  }
  0x14   : > { %v229_v1 = vld [vmem:[%s2618_s1 + $0xf8] sm:$0xff]  ;;  %262 = vmatpush.msra.mxu0 %v213_v0  ;;  %v228_v5 = vld [vmem:[%s2618_s1 + $0xf0] sm:$0xff]  ;;  %v227_v9 = vld [vmem:[%s2618_s1 + $0xe8] sm:$0xff]  ;;  %s1265_s19 = scalar_lea.sflag [#allocation3], %s188_s22 }
  0x15   : > { %v245_v2 = vld [vmem:[%s2618_s1 + $0x178] sm:$0xff]  ;;  %285 = vmatpush.msra.mxu1 %v229_v1  ;;  %v244_v6 = vld [vmem:[%s2618_s1 + $0x170] sm:$0xff]  ;;  %v243_v10 = vld [vmem:[%s2618_s1 + $0x168] sm:$0xff]  ;;  %s1514_s5 = sshll.u32 %s1967_s30, 4 }
  0x16   : > { %v261_v3 = vld [vmem:[%s2618_s1 + $0x1f8] sm:$0xff]  ;;  %308 = vmatpush.msra.mxu2 %v245_v2  ;;  %v260_v7 = vld [vmem:[%s2618_s1 + $0x1f0] sm:$0xff]  ;;  %263 = vmatpush.msra.mxu0 %v212_v4  ;;  %v259_v11 = vld [vmem:[%s2618_s1 + $0x1e8] sm:$0xff]  ;;  %s2015_s28 = scalar_lea.vmem %s2617_s0, %s1514_s5  ;;  %s1604_s5 = sshra.s32 %s1280_s11, 4  ;;  %s1605_s5 = int_to_ptr.hbm [resolvable:$true] %s1604_s5 }
  0x17   : > { %331 = vmatpush.msra.mxu3 %v261_v3  ;;  %286 = vmatpush.msra.mxu1 %v228_v5  ;;  %v210_v12 = vld [vmem:[%s2618_s1 + $0x60] sm:$0xff]  ;;  %v209_v16 = vld [vmem:[%s2618_s1 + $0x58] sm:$0xff]  ;;  %v208_v20 = vld [vmem:[%s2618_s1 + $0x50] sm:$0xff]  ;;  %s1606_s12 = scalar_lea.hbm %s1605_s5, 16  ;;  %p1611_p0 = scmp.lt.s32.totalorder %s1605_s5, %s2621_s4 }
  0x18   : > { %309 = vmatpush.msra.mxu2 %v244_v6  ;;  %v226_v13 = vld [vmem:[%s2618_s1 + $0xe0] sm:$0xff]  ;;  %264 = vmatpush.msra.mxu0 %v211_v8  ;;  %v225_v17 = vld [vmem:[%s2618_s1 + $0xd8] sm:$0xff]  ;;  %v224_v21 = vld [vmem:[%s2618_s1 + $0xd0] sm:$0xff]  ;;  %p1607_p11 = scmp.ne.s32.totalorder %s1605_s5, %s1606_s12  ;;  %p1612_p1 = scmp.lt.s32.totalorder %s1610_s14, %s1606_s12 }
  0x19   : > { %332 = vmatpush.msra.mxu3 %v260_v7  ;;  %287 = vmatpush.msra.mxu1 %v227_v9  ;;  %v242_v14 = vld [vmem:[%s2618_s1 + $0x160] sm:$0xff]  ;;  %v241_v18 = vld [vmem:[%s2618_s1 + $0x158] sm:$0xff]  ;;  %v240_v22 = vld [vmem:[%s2618_s1 + $0x150] sm:$0xff] }
  0x1a   : > { %v258_v15 = vld [vmem:[%s2618_s1 + $0x1e0] sm:$0xff]  ;;  %310 = vmatpush.msra.mxu2 %v243_v10  ;;  %265 = vmatpush.msra.mxu0 %v210_v12  ;;  %v257_v19 = vld [vmem:[%s2618_s1 + $0x1d8] sm:$0xff]  ;;  %v256_v23 = vld [vmem:[%s2618_s1 + $0x1d0] sm:$0xff]  ;;  %p1608_p12 = pnand %p1607_p11, %p1719_p5  ;;  %p1613_p2 = por %p1612_p1, %p1611_p0 }
  0x1b   : > { %333 = vmatpush.msra.mxu3 %v259_v11  ;;  %288 = vmatpush.msra.mxu1 %v226_v13  ;;  %v207_v24 = vld [vmem:[%s2618_s1 + $0x48] sm:$0xff]  ;;  %v206_v28 = vld [vmem:[%s2618_s1 + $0x40] sm:$0xff]  ;;  %v205_v32 = vld [vmem:[%s2618_s1 + $0x38] sm:$0xff] }
  0x1c   : > { %311 = vmatpush.msra.mxu2 %v242_v14  ;;  %266 = vmatpush.msra.mxu0 %v209_v16  ;;  %v223_v25 = vld [vmem:[%s2618_s1 + $0xc8] sm:$0xff]  ;;  %v222_v29 = vld [vmem:[%s2618_s1 + $0xc0] sm:$0xff]  ;;  %v221_v33 = vld [vmem:[%s2618_s1 + $0xb8] sm:$0xff]  ;;  %p1609_p13 = pneg %p1608_p12 }
  0x1d   : > { %334 = vmatpush.msra.mxu3 %v258_v15  ;;  %289 = vmatpush.msra.mxu1 %v225_v17  ;;  %v239_v26 = vld [vmem:[%s2618_s1 + $0x148] sm:$0xff]  ;;  %v238_v30 = vld [vmem:[%s2618_s1 + $0x140] sm:$0xff]  ;;  %v237_v34 = vld [vmem:[%s2618_s1 + $0x138] sm:$0xff] }
  0x1e   : > { %312 = vmatpush.msra.mxu2 %v241_v18  ;;  %267 = vmatpush.msra.mxu0 %v208_v20  ;;  %v255_v27 = vld [vmem:[%s2618_s1 + $0x1c8] sm:$0xff]  ;;  %v254_v31 = vld [vmem:[%s2618_s1 + $0x1c0] sm:$0xff]  ;;  %v253_v35 = vld [vmem:[%s2618_s1 + $0x1b8] sm:$0xff]  ;;  %p1614_p3 = pnand %p1613_p2, %p1609_p13 }
  0x1f   : > { %335 = vmatpush.msra.mxu3 %v257_v19  ;;  %290 = vmatpush.msra.mxu1 %v224_v21  ;;  %v204_v36 = vld [vmem:[%s2618_s1 + $0x30] sm:$0xff]  ;;  %v203_v40 = vld [vmem:[%s2618_s1 + $0x28] sm:$0xff]  ;;  %v202_v44 = vld [vmem:[%s2618_s1 + $0x20] sm:$0xff] }
  0x20   : > { %313 = vmatpush.msra.mxu2 %v240_v22  ;;  %268 = vmatpush.msra.mxu0 %v207_v24  ;;  %v220_v37 = vld [vmem:[%s2618_s1 + $0xb0] sm:$0xff]  ;;  %v219_v41 = vld [vmem:[%s2618_s1 + $0xa8] sm:$0xff]  ;;  %v218_v45 = vld [vmem:[%s2618_s1 + $0xa0] sm:$0xff] }
  0x21   : > { %336 = vmatpush.msra.mxu3 %v256_v23  ;;  %291 = vmatpush.msra.mxu1 %v223_v25  ;;  %v236_v38 = vld [vmem:[%s2618_s1 + $0x130] sm:$0xff]  ;;  %v235_v42 = vld [vmem:[%s2618_s1 + $0x128] sm:$0xff]  ;;  %v234_v46 = vld [vmem:[%s2618_s1 + $0x120] sm:$0xff] }
  0x22   : > { %314 = vmatpush.msra.mxu2 %v239_v26  ;;  %269 = vmatpush.msra.mxu0 %v206_v28  ;;  %v252_v39 = vld [vmem:[%s2618_s1 + $0x1b0] sm:$0xff]  ;;  %v251_v43 = vld [vmem:[%s2618_s1 + $0x1a8] sm:$0xff]  ;;  %v250_v47 = vld [vmem:[%s2618_s1 + $0x1a0] sm:$0xff] }
  0x23   : > { %337 = vmatpush.msra.mxu3 %v255_v27  ;;  %292 = vmatpush.msra.mxu1 %v222_v29  ;;  %v201_v48 = vld [vmem:[%s2618_s1 + $0x18] sm:$0xff]  ;;  %v200_v52 = vld [vmem:[%s2618_s1 + $0x10] sm:$0xff]  ;;  %v199_v56 = vld [vmem:[%s2618_s1 + $0x8] sm:$0xff] }
  0x24   : > { %315 = vmatpush.msra.mxu2 %v238_v30  ;;  %270 = vmatpush.msra.mxu0 %v205_v32  ;;  %v217_v49 = vld [vmem:[%s2618_s1 + $0x98] sm:$0xff]  ;;  %v216_v53 = vld [vmem:[%s2618_s1 + $0x90] sm:$0xff]  ;;  %v215_v57 = vld [vmem:[%s2618_s1 + $0x88] sm:$0xff] }
  0x25   : > { %338 = vmatpush.msra.mxu3 %v254_v31  ;;  %293 = vmatpush.msra.mxu1 %v221_v33  ;;  %v233_v50 = vld [vmem:[%s2618_s1 + $0x118] sm:$0xff]  ;;  %v232_v54 = vld [vmem:[%s2618_s1 + $0x110] sm:$0xff]  ;;  %v231_v58 = vld [vmem:[%s2618_s1 + $0x108] sm:$0xff] }
  0x26   : > { %316 = vmatpush.msra.mxu2 %v237_v34  ;;  %271 = vmatpush.msra.mxu0 %v204_v36  ;;  %v249_v51 = vld [vmem:[%s2618_s1 + $0x198] sm:$0xff]  ;;  %v248_v55 = vld [vmem:[%s2618_s1 + $0x190] sm:$0xff]  ;;  %v247_v59 = vld [vmem:[%s2618_s1 + $0x188] sm:$0xff] }
  0x27   : > { %339 = vmatpush.msra.mxu3 %v253_v35  ;;  %294 = vmatpush.msra.mxu1 %v220_v37  ;;  %v198_v60 = vld [vmem:[%s2618_s1] sm:$0xff]  ;;  %v1364_v0 = vld [vmem:[%s2618_s1 + $0x278] sm:$0xff]  ;;  %v1363_v4 = vld [vmem:[%s2618_s1 + $0x270] sm:$0xff] }
  0x28   : > { %317 = vmatpush.msra.mxu2 %v236_v38  ;;  %272 = vmatpush.msra.mxu0 %v203_v40  ;;  %v214_v61 = vld [vmem:[%s2618_s1 + $0x80] sm:$0xff]  ;;  %v1380_v1 = vld [vmem:[%s2618_s1 + $0x2f8] sm:$0xff]  ;;  %v1379_v5 = vld [vmem:[%s2618_s1 + $0x2f0] sm:$0xff] }
  0x29   : > { %340 = vmatpush.msra.mxu3 %v252_v39  ;;  %295 = vmatpush.msra.mxu1 %v219_v41  ;;  %v230_v62 = vld [vmem:[%s2618_s1 + $0x100] sm:$0xff]  ;;  %v1396_v2 = vld [vmem:[%s2618_s1 + $0x378] sm:$0xff]  ;;  %v1395_v6 = vld [vmem:[%s2618_s1 + $0x370] sm:$0xff] }
  0x2a   : > { %318 = vmatpush.msra.mxu2 %v235_v42  ;;  %273 = vmatpush.msra.mxu0 %v202_v44  ;;  %v246_v63 = vld [vmem:[%s2618_s1 + $0x180] sm:$0xff]  ;;  %v1412_v3 = vld [vmem:[%s2618_s1 + $0x3f8] sm:$0xff]  ;;  %v1411_v7 = vld [vmem:[%s2618_s1 + $0x3f0] sm:$0xff] }
  0x2b   : > { %341 = vmatpush.msra.mxu3 %v251_v43  ;;  %296 = vmatpush.msra.mxu1 %v218_v45  ;;  %v1362_v8 = vld [vmem:[%s2618_s1 + $0x268] sm:$0xff]  ;;  %v1361_v12 = vld [vmem:[%s2618_s1 + $0x260] sm:$0xff]  ;;  %v1360_v16 = vld [vmem:[%s2618_s1 + $0x258] sm:$0xff] }
  0x2c   : > { %319 = vmatpush.msra.mxu2 %v234_v46  ;;  %274 = vmatpush.msra.mxu0 %v201_v48  ;;  %v1378_v9 = vld [vmem:[%s2618_s1 + $0x2e8] sm:$0xff]  ;;  %v1377_v13 = vld [vmem:[%s2618_s1 + $0x2e0] sm:$0xff]  ;;  %v1376_v17 = vld [vmem:[%s2618_s1 + $0x2d8] sm:$0xff] }
  0x2d   : > { %342 = vmatpush.msra.mxu3 %v250_v47  ;;  %297 = vmatpush.msra.mxu1 %v217_v49  ;;  %v1394_v10 = vld [vmem:[%s2618_s1 + $0x368] sm:$0xff]  ;;  %v1393_v14 = vld [vmem:[%s2618_s1 + $0x360] sm:$0xff]  ;;  %v1392_v18 = vld [vmem:[%s2618_s1 + $0x358] sm:$0xff] }
  0x2e   : > { %320 = vmatpush.msra.mxu2 %v233_v50  ;;  %275 = vmatpush.msra.mxu0 %v200_v52  ;;  %v1410_v11 = vld [vmem:[%s2618_s1 + $0x3e8] sm:$0xff]  ;;  %v1409_v15 = vld [vmem:[%s2618_s1 + $0x3e0] sm:$0xff]  ;;  %v1408_v19 = vld [vmem:[%s2618_s1 + $0x3d8] sm:$0xff] }
  0x2f   : > { %343 = vmatpush.msra.mxu3 %v249_v51  ;;  %298 = vmatpush.msra.mxu1 %v216_v53  ;;  %v1359_v20 = vld [vmem:[%s2618_s1 + $0x250] sm:$0xff]  ;;  %v1358_v24 = vld [vmem:[%s2618_s1 + $0x248] sm:$0xff]  ;;  %v1357_v28 = vld [vmem:[%s2618_s1 + $0x240] sm:$0xff] }
  0x30   : > { %321 = vmatpush.msra.mxu2 %v232_v54  ;;  %276 = vmatpush.msra.mxu0 %v199_v56  ;;  %v1375_v21 = vld [vmem:[%s2618_s1 + $0x2d0] sm:$0xff]  ;;  %v1374_v25 = vld [vmem:[%s2618_s1 + $0x2c8] sm:$0xff]  ;;  %v1373_v29 = vld [vmem:[%s2618_s1 + $0x2c0] sm:$0xff] }
  0x31   : > { %344 = vmatpush.msra.mxu3 %v248_v55  ;;  %299 = vmatpush.msra.mxu1 %v215_v57  ;;  %v1391_v22 = vld [vmem:[%s2618_s1 + $0x350] sm:$0xff]  ;;  %v1390_v26 = vld [vmem:[%s2618_s1 + $0x348] sm:$0xff]  ;;  %v1389_v30 = vld [vmem:[%s2618_s1 + $0x340] sm:$0xff] }
  0x32   : > { %322 = vmatpush.msra.mxu2 %v231_v58  ;;  %277 = vmatpush.msra.mxu0 %v198_v60  ;;  %v1407_v23 = vld [vmem:[%s2618_s1 + $0x3d0] sm:$0xff]  ;;  %v1406_v27 = vld [vmem:[%s2618_s1 + $0x3c8] sm:$0xff]  ;;  %v1405_v31 = vld [vmem:[%s2618_s1 + $0x3c0] sm:$0xff] }
  0x33   : > { %345 = vmatpush.msra.mxu3 %v247_v59  ;;  %300 = vmatpush.msra.mxu1 %v214_v61  ;;  %v2030_v32 = vld [vmem:[%s2015_s28] sm:$0xff]  ;;  %v1356_v33 = vld [vmem:[%s2618_s1 + $0x238] sm:$0xff]  ;;  %v1355_v37 = vld [vmem:[%s2618_s1 + $0x230] sm:$0xff] }
  0x34   : > { %323 = vmatpush.msra.mxu2 %v230_v62  ;;  %419 = vmatpush.msrb.mxu0 %v1364_v0  ;;  %v1372_v34 = vld [vmem:[%s2618_s1 + $0x2b8] sm:$0xff]  ;;  %v1371_v38 = vld [vmem:[%s2618_s1 + $0x2b0] sm:$0xff]  ;;  %v1354_v41 = vld [vmem:[%s2618_s1 + $0x228] sm:$0xff] }
  0x35   : > { %346 = vmatpush.msra.mxu3 %v246_v63  ;;  %442 = vmatpush.msrb.mxu1 %v1380_v1  ;;  %v1388_v35 = vld [vmem:[%s2618_s1 + $0x338] sm:$0xff]  ;;  %v1387_v39 = vld [vmem:[%s2618_s1 + $0x330] sm:$0xff]  ;;  %v1370_v42 = vld [vmem:[%s2618_s1 + $0x2a8] sm:$0xff] }
  0x36   : > { %465 = vmatpush.msrb.mxu2 %v1396_v2  ;;  %420 = vmatpush.msrb.mxu0 %v1363_v4  ;;  %v1404_v36 = vld [vmem:[%s2618_s1 + $0x3b8] sm:$0xff]  ;;  %v1403_v40 = vld [vmem:[%s2618_s1 + $0x3b0] sm:$0xff]  ;;  %v1386_v43 = vld [vmem:[%s2618_s1 + $0x328] sm:$0xff] }
  0x37   : > { %488 = vmatpush.msrb.mxu3 %v1412_v3  ;;  %443 = vmatpush.msrb.mxu1 %v1379_v5  ;;  %v1402_v44 = vld [vmem:[%s2618_s1 + $0x3a8] sm:$0xff]  ;;  %v1353_v45 = vld [vmem:[%s2618_s1 + $0x220] sm:$0xff]  ;;  %v1352_v50 = vld [vmem:[%s2618_s1 + $0x218] sm:$0xff] }
  0x38   : > { %466 = vmatpush.msrb.mxu2 %v1395_v6  ;;  %421 = vmatpush.msrb.mxu0 %v1362_v8  ;;  %v1369_v46 = vld [vmem:[%s2618_s1 + $0x2a0] sm:$0xff]  ;;  %v2085_v49 = vld [vmem:[%s2015_s28 + $0x8] sm:$0xff]  ;;  %v1368_v51 = vld [vmem:[%s2618_s1 + $0x298] sm:$0xff]  ;;  %s1346_s28 = sshll.u32 %s188_s22, 4 }
  0x39   : > { %489 = vmatpush.msrb.mxu3 %v1411_v7  ;;  %444 = vmatpush.msrb.mxu1 %v1378_v9  ;;  %v1385_v47 = vld [vmem:[%s2618_s1 + $0x320] sm:$0xff]  ;;  %v1384_v52 = vld [vmem:[%s2618_s1 + $0x318] sm:$0xff]  ;;  %v1351_v54 = vld [vmem:[%s2618_s1 + $0x210] sm:$0xff]  ;;  %s190_s6 = scalar_lea.vmem [#allocation2], %s1346_s28 }
  0x3a   : > { %467 = vmatpush.msrb.mxu2 %v1394_v10  ;;  %422 = vmatpush.msrb.mxu0 %v1361_v12  ;;  %v1401_v48 = vld [vmem:[%s2618_s1 + $0x3a0] sm:$0xff]  ;;  %v1400_v53 = vld [vmem:[%s2618_s1 + $0x398] sm:$0xff]  ;;  %v1367_v55 = vld [vmem:[%s2618_s1 + $0x290] sm:$0xff]  ;;  %s1277_s10 = sshll.u32 %s190_s6, 4  ;;  %s1278_s10 = int_to_ptr.vmem [resolvable:$true] %s1277_s10 }
  0x3b   : > { %490 = vmatpush.msrb.mxu3 %v1410_v11  ;;  %445 = vmatpush.msrb.mxu1 %v1377_v13  ;;  %v1383_v56 = vld [vmem:[%s2618_s1 + $0x310] sm:$0xff]  ;;  %v1350_v58 = vld [vmem:[%s2618_s1 + $0x208] sm:$0xff]  ;;  %v1349_v62 = vld [vmem:[%s2618_s1 + $0x200] sm:$0xff] }
  0x3c   : > { %468 = vmatpush.msrb.mxu2 %v1393_v14  ;;  %423 = vmatpush.msrb.mxu0 %v1360_v16  ;;  %v1399_v57 = vld [vmem:[%s2618_s1 + $0x390] sm:$0xff]  ;;  %v1366_v59 = vld [vmem:[%s2618_s1 + $0x288] sm:$0xff]  ;;  %v1365_v63 = vld [vmem:[%s2618_s1 + $0x280] sm:$0xff] }
  0x3d   : > { %491 = vmatpush.msrb.mxu3 %v1409_v15  ;;  %446 = vmatpush.msrb.mxu1 %v1376_v17  ;;  %v1382_v60 = vld [vmem:[%s2618_s1 + $0x308] sm:$0xff]  ;;  %v1381_v0 = vld [vmem:[%s2618_s1 + $0x300] sm:$0xff]  ;;  %v1428_v2 = vld [vmem:[%s2618_s1 + $0x478] sm:$0xff] }
  0x3e   : > { %469 = vmatpush.msrb.mxu2 %v1392_v18  ;;  %424 = vmatpush.msrb.mxu0 %v1359_v20  ;;  %v1398_v61 = vld [vmem:[%s2618_s1 + $0x388] sm:$0xff]  ;;  %v1397_v1 = vld [vmem:[%s2618_s1 + $0x380] sm:$0xff]  ;;  %v1444_v3 = vld [vmem:[%s2618_s1 + $0x4f8] sm:$0xff] }
  0x3f   : > { %492 = vmatpush.msrb.mxu3 %v1408_v19  ;;  %447 = vmatpush.msrb.mxu1 %v1375_v21  ;;  %v1460_v4 = vld [vmem:[%s2618_s1 + $0x578] sm:$0xff]  ;;  %v1427_v6 = vld [vmem:[%s2618_s1 + $0x470] sm:$0xff]  ;;  %v1426_v10 = vld [vmem:[%s2618_s1 + $0x468] sm:$0xff] }
  0x40   : > { %470 = vmatpush.msrb.mxu2 %v1391_v22  ;;  %425 = vmatpush.msrb.mxu0 %v1358_v24  ;;  %v1476_v5 = vld [vmem:[%s2618_s1 + $0x5f8] sm:$0xff]  ;;  %v1443_v7 = vld [vmem:[%s2618_s1 + $0x4f0] sm:$0xff]  ;;  %v1442_v11 = vld [vmem:[%s2618_s1 + $0x4e8] sm:$0xff] }
  0x41   : > { %493 = vmatpush.msrb.mxu3 %v1407_v23  ;;  %448 = vmatpush.msrb.mxu1 %v1374_v25  ;;  %v1459_v8 = vld [vmem:[%s2618_s1 + $0x570] sm:$0xff]  ;;  %v1458_v12 = vld [vmem:[%s2618_s1 + $0x568] sm:$0xff]  ;;  %v1425_v14 = vld [vmem:[%s2618_s1 + $0x460] sm:$0xff] }
  0x42   : > { %471 = vmatpush.msrb.mxu2 %v1390_v26  ;;  %426 = vmatpush.msrb.mxu0 %v1357_v28  ;;  %v1475_v9 = vld [vmem:[%s2618_s1 + $0x5f0] sm:$0xff]  ;;  %v1474_v13 = vld [vmem:[%s2618_s1 + $0x5e8] sm:$0xff]  ;;  %v1441_v15 = vld [vmem:[%s2618_s1 + $0x4e0] sm:$0xff] }
  0x43   : > { %494 = vmatpush.msrb.mxu3 %v1406_v27  ;;  %449 = vmatpush.msrb.mxu1 %v1373_v29  ;;  %v1457_v16 = vld [vmem:[%s2618_s1 + $0x560] sm:$0xff]  ;;  %v1424_v18 = vld [vmem:[%s2618_s1 + $0x458] sm:$0xff]  ;;  %v1423_v22 = vld [vmem:[%s2618_s1 + $0x450] sm:$0xff] }
  0x44   : > { %472 = vmatpush.msrb.mxu2 %v1389_v30  ;;  %278 = vmatmul.f32.vlgmr.msra.gmra.mxu0 %v2030_v32  ;;  %v1473_v17 = vld [vmem:[%s2618_s1 + $0x5e0] sm:$0xff]  ;;  %v1440_v19 = vld [vmem:[%s2618_s1 + $0x4d8] sm:$0xff]  ;;  %v1439_v23 = vld [vmem:[%s2618_s1 + $0x4d0] sm:$0xff] }
  0x45   : > { %495 = vmatpush.msrb.mxu3 %v1405_v31  ;;  %301 = vmatmul.f32.vlgmr.msra.gmra.mxu1 %v2030_v32  ;;  %v1456_v20 = vld [vmem:[%s2618_s1 + $0x558] sm:$0xff]  ;;  %v1422_v24 = vld [vmem:[%s2618_s1 + $0x448] sm:$0xff]  ;;  %v1421_v26 = vld [vmem:[%s2618_s1 + $0x440] sm:$0xff] }
  0x46   : > { %324 = vmatmul.f32.vlgmr.msra.gmra.mxu2 %v2030_v32  ;;  %347 = vmatmul.f32.vlgmr.msra.gmra.mxu3 %v2030_v32  ;;  %v1472_v21 = vld [vmem:[%s2618_s1 + $0x5d8] sm:$0xff]  ;;  %v1438_v25 = vld [vmem:[%s2618_s1 + $0x4c8] sm:$0xff]  ;;  %v1437_v27 = vld [vmem:[%s2618_s1 + $0x4c0] sm:$0xff] }
  0x47   : > { %427 = vmatpush.msrb.mxu0 %v1356_v33  ;;  %450 = vmatpush.msrb.mxu1 %v1372_v34  ;;  %v1455_v28 = vld [vmem:[%s2618_s1 + $0x550] sm:$0xff]  ;;  %v1454_v29 = vld [vmem:[%s2618_s1 + $0x548] sm:$0xff]  ;;  %v1453_v30 = vld [vmem:[%s2618_s1 + $0x540] sm:$0xff] }
  0x48   : > { %473 = vmatpush.msrb.mxu2 %v1388_v35  ;;  %496 = vmatpush.msrb.mxu3 %v1404_v36  ;;  %v1420_v31 = vld [vmem:[%s2618_s1 + $0x438] sm:$0xff]  ;;  %v1471_v34 = vld [vmem:[%s2618_s1 + $0x5d0] sm:$0xff] }
  0x49   : > { %428 = vmatpush.msrb.mxu0 %v1355_v37  ;;  %451 = vmatpush.msrb.mxu1 %v1371_v38  ;;  %v1436_v33 = vld [vmem:[%s2618_s1 + $0x4b8] sm:$0xff]  ;;  %v1419_v35 = vld [vmem:[%s2618_s1 + $0x430] sm:$0xff]  ;;  %v1470_v37 = vld [vmem:[%s2618_s1 + $0x5c8] sm:$0xff] }
  0x4a   : > { %474 = vmatpush.msrb.mxu2 %v1387_v39  ;;  %497 = vmatpush.msrb.mxu3 %v1403_v40  ;;  %v1435_v36 = vld [vmem:[%s2618_s1 + $0x4b0] sm:$0xff]  ;;  %v1418_v38 = vld [vmem:[%s2618_s1 + $0x428] sm:$0xff]  ;;  %v1469_v40 = vld [vmem:[%s2618_s1 + $0x5c0] sm:$0xff] }
  0x4b   : > { %429 = vmatpush.msrb.mxu0 %v1354_v41  ;;  %452 = vmatpush.msrb.mxu1 %v1370_v42  ;;  %v1434_v39 = vld [vmem:[%s2618_s1 + $0x4a8] sm:$0xff]  ;;  %v1452_v41 = vld [vmem:[%s2618_s1 + $0x538] sm:$0xff]  ;;  %v1451_v42 = vld [vmem:[%s2618_s1 + $0x530] sm:$0xff] }
  0x4c   : > { %475 = vmatpush.msrb.mxu2 %v1386_v43  ;;  %498 = vmatpush.msrb.mxu3 %v1402_v44  ;;  %v1450_v43 = vld [vmem:[%s2618_s1 + $0x528] sm:$0xff]  ;;  %v1417_v44 = vld [vmem:[%s2618_s1 + $0x420] sm:$0xff] }
  0x4d   : > { %430 = vmatpush.msrb.mxu0 %v1353_v45  ;;  %453 = vmatpush.msrb.mxu1 %v1369_v46  ;;  %v1433_v45 = vld [vmem:[%s2618_s1 + $0x4a0] sm:$0xff]  ;;  %v1468_v46 = vld [vmem:[%s2618_s1 + $0x5b8] sm:$0xff] }
  0x4e   : > { %476 = vmatpush.msrb.mxu2 %v1385_v47  ;;  %499 = vmatpush.msrb.mxu3 %v1401_v48  ;;  %v1449_v47 = vld [vmem:[%s2618_s1 + $0x520] sm:$0xff]  ;;  %v1448_v48 = vld [vmem:[%s2618_s1 + $0x518] sm:$0xff] }
  0x4f   : > { %281 = vmatmul.f32.gmra.mxu0 %v2085_v49  ;;  %304 = vmatmul.f32.gmra.mxu1 %v2085_v49 }
  0x50   : > { %327 = vmatmul.f32.gmra.mxu2 %v2085_v49  ;;  %350 = vmatmul.f32.gmra.mxu3 %v2085_v49 }
  0x51   : > { %431 = vmatpush.msrb.mxu0 %v1352_v50  ;;  %454 = vmatpush.msrb.mxu1 %v1368_v51  ;;  %v1416_v50 = vld [vmem:[%s2618_s1 + $0x418] sm:$0xff] }
  0x52   : > { %477 = vmatpush.msrb.mxu2 %v1384_v52  ;;  %500 = vmatpush.msrb.mxu3 %v1400_v53  ;;  %v1432_v51 = vld [vmem:[%s2618_s1 + $0x498] sm:$0xff]  ;;  %v1467_v52 = vld [vmem:[%s2618_s1 + $0x5b0] sm:$0xff] }
  0x53   : > { %432 = vmatpush.msrb.mxu0 %v1351_v54  ;;  %455 = vmatpush.msrb.mxu1 %v1367_v55  ;;  %v1415_v53 = vld [vmem:[%s2618_s1 + $0x410] sm:$0xff]  ;;  %v1466_v55 = vld [vmem:[%s2618_s1 + $0x5a8] sm:$0xff] }
  0x54   : > { %478 = vmatpush.msrb.mxu2 %v1383_v56  ;;  %501 = vmatpush.msrb.mxu3 %v1399_v57  ;;  %v1431_v54 = vld [vmem:[%s2618_s1 + $0x490] sm:$0xff]  ;;  %v1414_v56 = vld [vmem:[%s2618_s1 + $0x408] sm:$0xff] }
  0x55   : > { %433 = vmatpush.msrb.mxu0 %v1350_v58  ;;  %456 = vmatpush.msrb.mxu1 %v1366_v59  ;;  %v1430_v57 = vld [vmem:[%s2618_s1 + $0x488] sm:$0xff]  ;;  %v1465_v58 = vld [vmem:[%s2618_s1 + $0x5a0] sm:$0xff]  ;;  %v1447_v59 = vld [vmem:[%s2618_s1 + $0x510] sm:$0xff] }
  0x56   : > { %479 = vmatpush.msrb.mxu2 %v1382_v60  ;;  %502 = vmatpush.msrb.mxu3 %v1398_v61  ;;  %v1446_v60 = vld [vmem:[%s2618_s1 + $0x508] sm:$0xff]  ;;  %v1413_v61 = vld [vmem:[%s2618_s1 + $0x400] sm:$0xff] }
  0x57   : > { %434 = vmatpush.msrb.mxu0 %v1349_v62  ;;  %457 = vmatpush.msrb.mxu1 %v1365_v63  ;;  %v1429_v62 = vld [vmem:[%s2618_s1 + $0x480] sm:$0xff]  ;;  %v1464_v63 = vld [vmem:[%s2618_s1 + $0x598] sm:$0xff] }
  0x58   : > { %480 = vmatpush.msrb.mxu2 %v1381_v0  ;;  %503 = vmatpush.msrb.mxu3 %v1397_v1  ;;  %v1463_v0 = vld [vmem:[%s2618_s1 + $0x590] sm:$0xff]  ;;  %v1445_v1 = vld [vmem:[%s2618_s1 + $0x500] sm:$0xff] }
  0x59   : > { %435 = vmatmul.f32.vlgmr.msrb.gmra.mxu0 %v2030_v32  ;;  %458 = vmatmul.f32.vlgmr.msrb.gmra.mxu1 %v2030_v32 }
  0x5a   : > { %481 = vmatmul.f32.vlgmr.msrb.gmra.mxu2 %v2030_v32  ;;  %504 = vmatmul.f32.vlgmr.msrb.gmra.mxu3 %v2030_v32 }
  0x5b   : > { %576 = vmatpush.msra.mxu0 %v1428_v2  ;;  %599 = vmatpush.msra.mxu1 %v1444_v3  ;;  %v1462_v2 = vld [vmem:[%s2618_s1 + $0x588] sm:$0xff]  ;;  %v1461_v3 = vld [vmem:[%s2618_s1 + $0x580] sm:$0xff] }
  0x5c   : > { %622 = vmatpush.msra.mxu2 %v1460_v4  ;;  %645 = vmatpush.msra.mxu3 %v1476_v5 }
  0x5d   : > { %577 = vmatpush.msra.mxu0 %v1427_v6  ;;  %600 = vmatpush.msra.mxu1 %v1443_v7 }
  0x5e   : > { %623 = vmatpush.msra.mxu2 %v1459_v8  ;;  %646 = vmatpush.msra.mxu3 %v1475_v9 }
  0x5f   : > { %578 = vmatpush.msra.mxu0 %v1426_v10  ;;  %601 = vmatpush.msra.mxu1 %v1442_v11 }
  0x60   : > { %624 = vmatpush.msra.mxu2 %v1458_v12  ;;  %647 = vmatpush.msra.mxu3 %v1474_v13 }
  0x61   : > { %438 = vmatmul.f32.gmra.mxu0 %v2085_v49  ;;  %461 = vmatmul.f32.gmra.mxu1 %v2085_v49 }
  0x62   : > { %484 = vmatmul.f32.gmra.mxu2 %v2085_v49  ;;  %507 = vmatmul.f32.gmra.mxu3 %v2085_v49 }
  0x63   : > { %579 = vmatpush.msra.mxu0 %v1425_v14  ;;  %602 = vmatpush.msra.mxu1 %v1441_v15 }
  0x64   : > { %625 = vmatpush.msra.mxu2 %v1457_v16  ;;  %648 = vmatpush.msra.mxu3 %v1473_v17 }
  0x65   : > { %580 = vmatpush.msra.mxu0 %v1424_v18  ;;  %603 = vmatpush.msra.mxu1 %v1440_v19 }
  0x66   : > { %626 = vmatpush.msra.mxu2 %v1456_v20  ;;  %649 = vmatpush.msra.mxu3 %v1472_v21 }
  0x67   : > { %581 = vmatpush.msra.mxu0 %v1423_v22  ;;  %604 = vmatpush.msra.mxu1 %v1439_v23 }
  0x68   : > { %627 = vmatpush.msra.mxu2 %v1455_v28  ;;  %650 = vmatpush.msra.mxu3 %v1471_v34 }
  0x69   : > { %582 = vmatpush.msra.mxu0 %v1422_v24  ;;  %605 = vmatpush.msra.mxu1 %v1438_v25 }
  0x6a   : > { %628 = vmatpush.msra.mxu2 %v1454_v29  ;;  %651 = vmatpush.msra.mxu3 %v1470_v37 }
  0x6b   : > { %583 = vmatpush.msra.mxu0 %v1421_v26  ;;  %606 = vmatpush.msra.mxu1 %v1437_v27 }
  0x6c   : > { %629 = vmatpush.msra.mxu2 %v1453_v30  ;;  %652 = vmatpush.msra.mxu3 %v1469_v40 }
  0x6d   : > { %584 = vmatpush.msra.mxu0 %v1420_v31  ;;  %607 = vmatpush.msra.mxu1 %v1436_v33 }
  0x6e   : > { %630 = vmatpush.msra.mxu2 %v1452_v41  ;;  %653 = vmatpush.msra.mxu3 %v1468_v46 }
  0x6f   : > { %585 = vmatpush.msra.mxu0 %v1419_v35  ;;  %608 = vmatpush.msra.mxu1 %v1435_v36 }
  0x70   : > { %631 = vmatpush.msra.mxu2 %v1451_v42  ;;  %654 = vmatpush.msra.mxu3 %v1467_v52 }
  0x71   : > { %586 = vmatpush.msra.mxu0 %v1418_v38  ;;  %609 = vmatpush.msra.mxu1 %v1434_v39 }
  0x72   : > { %632 = vmatpush.msra.mxu2 %v1450_v43  ;;  %655 = vmatpush.msra.mxu3 %v1466_v55 }
  0x73   : > { %587 = vmatpush.msra.mxu0 %v1417_v44  ;;  %610 = vmatpush.msra.mxu1 %v1433_v45 }
  0x74   : > { %633 = vmatpush.msra.mxu2 %v1449_v47  ;;  %656 = vmatpush.msra.mxu3 %v1465_v58 }
  0x75   : > { %588 = vmatpush.msra.mxu0 %v1416_v50  ;;  %611 = vmatpush.msra.mxu1 %v1432_v51 }
  0x76   : > { %634 = vmatpush.msra.mxu2 %v1448_v48  ;;  %657 = vmatpush.msra.mxu3 %v1464_v63 }
  0x77   : > { %589 = vmatpush.msra.mxu0 %v1415_v53  ;;  %612 = vmatpush.msra.mxu1 %v1431_v54 }
  0x78   : > { %635 = vmatpush.msra.mxu2 %v1447_v59  ;;  %658 = vmatpush.msra.mxu3 %v1463_v0 }
  0x79   : > { %590 = vmatpush.msra.mxu0 %v1414_v56  ;;  %613 = vmatpush.msra.mxu1 %v1430_v57 }
  0x7a   : > { %636 = vmatpush.msra.mxu2 %v1446_v60  ;;  %659 = vmatpush.msra.mxu3 %v1462_v2 }
  0x7b   : > { %591 = vmatpush.msra.mxu0 %v1413_v61  ;;  %614 = vmatpush.msra.mxu1 %v1429_v62 }
  0x7c   : > { %592 = vmatmul.f32.vlgmr.msra.gmra.mxu0 %v2030_v32  ;;  %615 = vmatmul.f32.vlgmr.msra.gmra.mxu1 %v2030_v32 }
  0x7d   : > { %637 = vmatpush.msra.mxu2 %v1445_v1  ;;  %660 = vmatpush.msra.mxu3 %v1461_v3 }
  0x7e   : > { %638 = vmatmul.f32.vlgmr.msra.gmra.mxu2 %v2030_v32  ;;  %661 = vmatmul.f32.vlgmr.msra.gmra.mxu3 %v2030_v32 }
  0x84   : > { %595 = vmatmul.f32.gmra.mxu0 %v2085_v49  ;;  %618 = vmatmul.f32.gmra.mxu1 %v2085_v49 }
  0x86   : > { %641 = vmatmul.f32.gmra.mxu2 %v2085_v49  ;;  %664 = vmatmul.f32.gmra.mxu3 %v2085_v49 }
  0xc1   : > { %v279_v4 = vpop.f32.mrf.mxu0 }
  0xc2   : > { %v302_v5 = vpop.f32.mrf.mxu1 }
  0xc9   : > { %v325_v6 = vpop.f32.mrf.mxu2  ;;  %v348_v7 = vpop.f32.mrf.mxu3 }
  0xcc   : > { %v282_v8 = vpop.f32.mrf.mxu0  ;;  %v305_v9 = vpop.f32.mrf.mxu1 }
  0xd3   : > { %v328_v10 = vpop.f32.mrf.mxu2  ;;  %v351_v11 = vpop.f32.mrf.mxu3 }
  0xd6   : > { %v436_v12 = vpop.f32.mrf.mxu0  ;;  %v459_v13 = vpop.f32.mrf.mxu1 }
  0xdd   : > { %v482_v32 = vpop.f32.mrf.mxu2  ;;  %v505_v14 = vpop.f32.mrf.mxu3 }
  0xde   : > { %v439_v15 = vpop.f32.mrf.mxu0  ;;  %v462_v16 = vpop.f32.mrf.mxu1 }
  0xdf   : > { %1477 = vmatpush.xpose.msk.msrb.mxu0 %vm668_vm0, %v439_v15  ;;  %1481 = vmatpush.xpose.msk.msrb.mxu1 %vm668_vm0, %v462_v16 }
  0xe3   : > { %1478 = vmatpush.xpose.msk.msrb.mxu0 %vm668_vm0, %v436_v12  ;;  %1482 = vmatpush.xpose.msk.msrb.mxu1 %vm668_vm0, %v459_v13 }
  0xe5   : > { %v485_v49 = vpop.f32.mrf.mxu2  ;;  %v508_v17 = vpop.f32.mrf.mxu3 }
  0xe6   : > { %1485 = vmatpush.xpose.msk.msrb.mxu2 %vm668_vm0, %v485_v49  ;;  %1489 = vmatpush.xpose.msk.msrb.mxu3 %vm668_vm0, %v508_v17 }
  0xe7   : > { %1479 = vmatmul.msk.f32.vlgmr.msrb.gmra.mxu0 %vm668_vm0, %v279_v4  ;;  %1483 = vmatmul.msk.f32.vlgmr.msrb.gmra.mxu1 %vm668_vm0, %v302_v5 }
  0xea   : > { %1486 = vmatpush.xpose.msk.msrb.mxu2 %vm668_vm0, %v482_v32  ;;  %1490 = vmatpush.xpose.msk.msrb.mxu3 %vm668_vm0, %v505_v14 }
  0xed   : > { %1487 = vmatmul.msk.f32.vlgmr.msrb.gmra.mxu2 %vm668_vm0, %v325_v6  ;;  %1491 = vmatmul.msk.f32.vlgmr.msrb.gmra.mxu3 %vm668_vm0, %v348_v7 }
  0xef   : > { %1480 = vmatmul.msk.f32.gmra.mxu0 %vm668_vm0, %v282_v8  ;;  %1484 = vmatmul.msk.f32.gmra.mxu1 %vm668_vm0, %v305_v9 }
  0xf5   : > { %1488 = vmatmul.msk.f32.gmra.mxu2 %vm668_vm0, %v328_v10  ;;  %1492 = vmatmul.msk.f32.gmra.mxu3 %vm668_vm0, %v351_v11 }
  0xf9   : > { %v593_v18 = vpop.f32.mrf.mxu0  ;;  %v616_v19 = vpop.f32.mrf.mxu1 }
 0x101   : > { %v596_v20 = vpop.f32.mrf.mxu0  ;;  %v619_v21 = vpop.f32.mrf.mxu1 }
 0x102   : > { %1022 = vmatpush.msra.mxu0 %v596_v20  ;;  %v639_v22 = vpop.f32.mrf.mxu2  ;;  %1051 = vmatpush.msra.mxu1 %v619_v21  ;;  %v662_v23 = vpop.f32.mrf.mxu3 }
 0x104   : > { %1023 = vmatpush.msra.mxu0 %v593_v18  ;;  %1052 = vmatpush.msra.mxu1 %v616_v19 }
 0x10a   : > { %v642_v24 = vpop.f32.mrf.mxu2  ;;  %v665_v25 = vpop.f32.mrf.mxu3 }
 0x10b   : > { %1080 = vmatpush.msra.mxu2 %v642_v24  ;;  %1109 = vmatpush.msra.mxu3 %v665_v25 }
 0x10d   : > { %1081 = vmatpush.msra.mxu2 %v639_v22  ;;  %1110 = vmatpush.msra.mxu3 %v662_v23 }
 0x164   : > { %v733_v26 = vpop.f32.mrf.mxu1  ;;  %v698_v31 = vpop.f32.mrf.mxu0 }
 0x165   : > { %v816_v27 = vsel %vm809_vm1, %v733_v26, -inf  ;;  %v810_v39 = vsel %vm809_vm1, %v698_v31, -inf }
 0x166   : > { %817 = vmax.xlane.f32.xlu2 %v816_v27 }
 0x16c   : > { %v701_v38 = vpop.f32.mrf.mxu0  ;;  %v736_v41 = vpop.f32.mrf.mxu1 }
 0x16d   : > { %v813_v40 = vsel %vm809_vm1, %v701_v38, -inf  ;;  %v819_v42 = vsel %vm809_vm1, %v736_v41, -inf }
 0x170   : > { %v768_v28 = vpop.f32.mrf.mxu2  ;;  %v803_v29 = vpop.f32.mrf.mxu3 }
 0x171   : > { %v822_v30 = vsel %vm809_vm1, %v768_v28, -inf  ;;  %v828_v35 = vsel %vm809_vm1, %v803_v29, -inf }
 0x172   : > { %823 = vmax.xlane.f32.xlu0 %v822_v30  ;;  %v1129_v30 = vld [vmem:[%s2619_s2 + $0x58] sm:$0xff] }
 0x173   : > { %1210 = vmatpush.msrb.mxu2 %v1129_v30 }
 0x178   : > { %v771_v33 = vpop.f32.mrf.mxu2  ;;  %v806_v34 = vpop.f32.mrf.mxu3 }
 0x179   : > { %v825_v36 = vsel %vm809_vm1, %v771_v33, -inf  ;;  %v831_v37 = vsel %vm809_vm1, %v806_v34, -inf }
 0x17a   : > { %829 = vmax.xlane.f32.xlu0 %v828_v35  ;;  %826 = vmax.xlane.f32.xlu1 %v825_v36 }
 0x17b   : > { %832 = vmax.xlane.f32.xlu2 %v831_v37 }
 0x182   : > { %811 = vmax.xlane.f32.xlu1 %v810_v39  ;;  %814 = vmax.xlane.f32.xlu0 %v813_v40 }
 0x18a   : > { %820 = vmax.xlane.f32.xlu1 %v819_v42 }
 0x1d9   : > { %v818_v44 = vpop.xlane.xlu2 %817 }
 0x1da   : > { %v836_v54 = vsub.f32 %v733_v26, %v818_v44 }
 0x1dc   : > { %v846_v59 = vmul.f32 1.442695, %v836_v54 }
 0x1e5   : > { %v824_v43 = vpop.xlane.xlu0 %823 }
 0x1e6   : > { %v838_v45 = vsub.f32 %v768_v28, %v824_v43 }
 0x1e8   : > { %v850_v46 = vmul.f32 1.442695, %v838_v45 }
 0x1ea   : > { %1558 = vpow2.f32 %v850_v46 }
 0x1ed   : > { %v830_v47 = vpop.xlane.xlu0 %829  ;;  %v827_v48 = vpop.xlane.xlu1 %826 }
 0x1ee   : > { %v840_v50 = vsub.f32 %v803_v29, %v830_v47  ;;  %v839_v51 = vsub.f32 %v771_v33, %v827_v48  ;;  %v833_v52 = vpop.xlane.xlu2 %832 }
 0x1ef   : > { %v841_v57 = vsub.f32 %v806_v34, %v833_v52 }
 0x1f0   : > { %v2371_v53 = vpop.eup %1558  ;;  %v854_v55 = vmul.f32 1.442695, %v840_v50  ;;  %v852_v56 = vmul.f32 1.442695, %v839_v51 }
 0x1f1   : > { %v870_v58 = vsel %vm809_vm1, %v2371_v53, 0.0  ;;  %v856_v60 = vmul.f32 1.442695, %v841_v57 }
 0x1f2   : > { %1560 = vpow2.f32 %v854_v55  ;;  %871 = vadd.xlane.f32.xlu2 %v870_v58 }
 0x1f3   : > { %1562 = vpow2.f32 %v852_v56 }
 0x1f4   : > { %1564 = vpow2.f32 %v846_v59 }
 0x1f5   : > { %v812_v61 = vpop.xlane.xlu1 %811  ;;  %v815_v62 = vpop.xlane.xlu0 %814  ;;  %1566 = vpow2.f32 %v856_v60 }
 0x1f6   : > { %v834_v63 = vsub.f32 %v698_v31, %v812_v61  ;;  %v835_v2 = vsub.f32 %v701_v38, %v815_v62  ;;  %v1128_v31 = vld [vmem:[%s2619_s2 + $0x50] sm:$0xff] }
 0x1f7   : > { %1211 = vmatpush.msrb.mxu2 %v1128_v31 }
 0x1f8   : > { %v2375_v0 = vpop.eup %1560  ;;  %v842_v1 = vmul.f32 1.442695, %v834_v63  ;;  %v844_v6 = vmul.f32 1.442695, %v835_v2 }
 0x1f9   : > { %v2377_v3 = vpop.eup %1562  ;;  %v876_v4 = vsel %vm809_vm1, %v2375_v0, 0.0 }
 0x1fa   : > { %1568 = vpow2.f32 %v842_v1  ;;  %v873_v5 = vsel %vm809_vm1, %v2377_v3, 0.0  ;;  %877 = vadd.xlane.f32.xlu0 %v876_v4  ;;  %v2383_v8 = vpop.eup %1564 }
 0x1fb   : > { %874 = vadd.xlane.f32.xlu1 %v873_v5  ;;  %v2385_v10 = vpop.eup %1566  ;;  %1570 = vpow2.f32 %v844_v6  ;;  %v864_v32 = vsel %vm809_vm1, %v2383_v8, 0.0 }
 0x1fc   : > { %v879_v14 = vsel %vm809_vm1, %v2385_v10, 0.0 }
 0x1fd   : > { %v821_v7 = vpop.xlane.xlu1 %820 }
 0x1fe   : > { %v837_v9 = vsub.f32 %v736_v41, %v821_v7  ;;  %v1127_v41 = vld [vmem:[%s2619_s2 + $0x48] sm:$0xff] }
 0x1ff   : > { %1212 = vmatpush.msrb.mxu2 %v1127_v41 }
 0x200   : > { %v2387_v11 = vpop.eup %1568  ;;  %v848_v12 = vmul.f32 1.442695, %v837_v9 }
 0x201   : > { %v858_v13 = vsel %vm809_vm1, %v2387_v11, 0.0  ;;  %v2395_v15 = vpop.eup %1570 }
 0x202   : > { %1572 = vpow2.f32 %v848_v12  ;;  %859 = vadd.xlane.f32.xlu2 %v858_v13  ;;  %865 = vadd.xlane.f32.xlu0 %v864_v32  ;;  %v861_v17 = vsel %vm809_vm1, %v2395_v15, 0.0 }
 0x203   : > { %880 = vadd.xlane.f32.xlu1 %v879_v14  ;;  %v1122_v14 = vld [vmem:[%s2619_s2 + $0x20] sm:$0xff] }
 0x208   : > { %v2397_v16 = vpop.eup %1572 }
 0x209   : > { %v867_v49 = vsel %vm809_vm1, %v2397_v16, 0.0 }
 0x20a   : > { %868 = vadd.xlane.f32.xlu0 %v867_v49  ;;  %862 = vadd.xlane.f32.xlu2 %v861_v17 }
 0x265   : > { %v872_v18 = vpop.xlane.xlu2 %871 }
 0x266   : > { %1574 = vrcp.f32 %v872_v18  ;;  %v947_v25 = vand.u32 2147483647, %v872_v18  ;;  %v949_v26 = vand.u32 2147483648, %v872_v18  ;;  %vm943_vm3 = vweird.f32 %v872_v18 }
 0x268   : > { %vm948_vm5 = vcmp.eq.f32.partialorder %v947_v25, 8.507059e+37  ;;  %v950_v38 = vor.u32 1.1754944e-38, %v949_v26 }
 0x26c   : > { %v1575_v19 = vpop.eup %1574 }
 0x26d   : > { %v939_v20 = vmul.f32 %v1575_v19, %v872_v18  ;;  %v878_v21 = vpop.xlane.xlu0 %877  ;;  %vm944_vm2 = vweird.f32 %v1575_v19 }
 0x26e   : > { %v2403_v22 = vpop.xlane.xlu1 %874  ;;  %1576 = vrcp.f32 %v878_v21  ;;  %vm2406_vm4 = vmor %vm943_vm3, %vm944_vm2  ;;  %v975_v43 = vand.u32 2147483647, %v878_v21  ;;  %v977_v44 = vand.u32 2147483648, %v878_v21  ;;  %vm971_vm8 = vweird.f32 %v878_v21 }
 0x26f   : > { %v940_v23 = vsub.f32 1.0, %v939_v20  ;;  %1578 = vrcp.f32 %v2403_v22  ;;  %v963_v47 = vand.u32 2147483648, %v2403_v22  ;;  %v961_v48 = vand.u32 2147483647, %v2403_v22 }
 0x270   : > { %vm957_vm7 = vweird.f32 %v2403_v22  ;;  %vm2438_vm9 = vcmp.eq.f32.partialorder %v975_v43, 8.507059e+37  ;;  %v978_v59 = vor.u32 1.1754944e-38, %v977_v44 }
 0x271   : > { %v941_v24 = vmul.f32 %v1575_v19, %v940_v23  ;;  %v964_v57 = vor.u32 1.1754944e-38, %v963_v47  ;;  %vm2448_vm11 = vcmp.eq.f32.partialorder %v961_v48, 8.507059e+37 }
 0x273   : > { %v942_v27 = vadd.f32 %v1575_v19, %v941_v24 }
 0x274   : > { %v1577_v28 = vpop.eup %1576 }
 0x275   : > { %v2416_v33 = vpop.eup %1578  ;;  %v946_v34 = vsel %vm2406_vm4, %v1575_v19, %v942_v27  ;;  %v967_v35 = vmul.f32 %v1577_v28, %v878_v21  ;;  %v2420_v36 = vpop.xlane.xlu2 %859  ;;  %vm972_vm6 = vweird.f32 %v1577_v28 }
 0x276   : > { %v2422_v37 = vpop.xlane.xlu0 %865  ;;  %v953_v39 = vmul.f32 %v2416_v33, %v2403_v22  ;;  %1580 = vrcp.f32 %v2420_v36  ;;  %v2427_v40 = vpop.xlane.xlu1 %880  ;;  %v951_v45 = vsel %vm948_vm5, %v950_v38, %v946_v34  ;;  %vm2443_vm10 = vmor %vm971_vm8, %vm972_vm6  ;;  %v891_v60 = vand.u32 2147483647, %v2420_v36 }
 0x277   : > { %v968_v42 = vsub.f32 1.0, %v967_v35  ;;  %1582 = vrcp.f32 %v2427_v40  ;;  %v998_v55 = vmul.f32 %v2371_v53, %v951_v45  ;;  %vm887_vm12 = vweird.f32 %v2420_v36 }
 0x278   : > { %v954_v46 = vsub.f32 1.0, %v953_v39  ;;  %1584 = vrcp.f32 %v2422_v37  ;;  %v893_v1 = vand.u32 2147483648, %v2420_v36  ;;  %vm985_vm13 = vweird.f32 %v2427_v40 }
 0x279   : > { %v969_v50 = vmul.f32 %v1577_v28, %v968_v42  ;;  %1497 = vmatmul.msk.f32.vlgmr.msra.gmra.mxu2 %vm809_vm1, %v998_v55  ;;  %v989_v5 = vand.u32 2147483647, %v2427_v40  ;;  %v991_v6 = vand.u32 2147483648, %v2427_v40  ;;  %vm958_vm14 = vweird.f32 %v2416_v33 }
 0x27a   : > { %v955_v51 = vmul.f32 %v2416_v33, %v954_v46  ;;  %vm2474_vm15 = vcmp.eq.f32.partialorder %v891_v60, 8.507059e+37  ;;  %v894_v19 = vor.u32 1.1754944e-38, %v893_v1  ;;  %v919_v23 = vand.u32 2147483647, %v2422_v37  ;;  %vm959_vm3 = vmor %vm957_vm7, %vm958_vm14  ;;  %v1126_v1 = vld [vmem:[%s2619_s2 + $0x40] sm:$0xff] }
 0x27b   : > { %v970_v52 = vadd.f32 %v1577_v28, %v969_v50  ;;  %v921_v24 = vand.u32 2147483648, %v2422_v37  ;;  %vm2493_vm7 = vcmp.eq.f32.partialorder %v989_v5, 8.507059e+37  ;;  %v992_v35 = vor.u32 1.1754944e-38, %v991_v6  ;;  %1213 = vmatpush.msrb.mxu2 %v1126_v1  ;;  %v1120_v5 = vld [vmem:[%s2619_s2 + $0x10] sm:$0xff] }
 0x27c   : > { %v1581_v56 = vpop.eup %1580  ;;  %v956_v13 = vadd.f32 %v2416_v33, %v955_v51  ;;  %v1124_v6 = vld [vmem:[%s2619_s2 + $0x30] sm:$0xff] }
 0x27d   : > { %v2452_v62 = vpop.eup %1582  ;;  %v974_v63 = vsel %vm2443_vm10, %v1577_v28, %v970_v52  ;;  %v883_v53 = vmul.f32 %v1581_v56, %v2420_v36  ;;  %v2460_v2 = vpop.xlane.xlu2 %862  ;;  %vm888_vm2 = vweird.f32 %v1581_v56 }
 0x27e   : > { %v981_v4 = vmul.f32 %v2452_v62, %v2427_v40  ;;  %v2467_v7 = vpop.xlane.xlu0 %868  ;;  %v1585_v9 = vpop.eup %1584  ;;  %1586 = vrcp.f32 %v2460_v2  ;;  %v979_v32 = vsel %vm2438_vm9, %v978_v59, %v974_v63  ;;  %vm986_vm4 = vweird.f32 %v2452_v62  ;;  %vm889_vm5 = vmor %vm887_vm12, %vm888_vm2 }
 0x27f   : > { %v884_v12 = vsub.f32 1.0, %v883_v53  ;;  %v911_v17 = vmul.f32 %v1585_v9, %v2422_v37  ;;  %1588 = vrcp.f32 %v2467_v7  ;;  %v960_v26 = vsel %vm959_vm3, %v2416_v33, %v956_v13  ;;  %vm2505_vm8 = vmor %vm985_vm13, %vm986_vm4  ;;  %v1130_v13 = vld [vmem:[%s2619_s2 + $0x60] sm:$0xff] }
 0x280   : > { %v982_v49 = vsub.f32 1.0, %v981_v4  ;;  %v1000_v27 = vmul.f32 %v2375_v0, %v979_v32  ;;  %vm916_vm6 = vweird.f32 %v1585_v9  ;;  %v965_v30 = vsel %vm2448_vm11, %v964_v57, %v960_v26  ;;  %v1125_v4 = vld [vmem:[%s2619_s2 + $0x38] sm:$0xff]  ;;  %v1118_v32 = vld [vmem:[%s2619_s2] sm:$0xff] }
 0x281   : > { %v885_v18 = vmul.f32 %v1581_v56, %v884_v12  ;;  %v912_v21 = vsub.f32 1.0, %v911_v17  ;;  %v999_v33 = vmul.f32 %v2377_v3, %v965_v30  ;;  %vm915_vm9 = vweird.f32 %v2422_v37  ;;  %1181 = vmatpush.msrb.mxu1 %v1125_v4  ;;  %v1123_v12 = vld [vmem:[%s2619_s2 + $0x28] sm:$0xff]  ;;  %v1557_v30 = vld [vmem:[%s2620_s3] ss:$0 sm:$0xff] }
 0x282   : > { %v983_v20 = vmul.f32 %v2452_v62, %v982_v49  ;;  %1499 = vmatmul.msk.f32.vlgmr.msra.gmra.mxu3 %vm809_vm1, %v1000_v27  ;;  %vm917_vm10 = vmor %vm915_vm9, %vm916_vm6  ;;  %vm920_vm11 = vcmp.eq.f32.partialorder %v919_v23, 8.507059e+37  ;;  %v922_v3 = vor.u32 1.1754944e-38, %v921_v24  ;;  %v905_v45 = vand.u32 2147483647, %v2460_v2 }
 0x283   : > { %v886_v25 = vadd.f32 %v1581_v56, %v885_v18  ;;  %v913_v29 = vmul.f32 %v1585_v9, %v912_v21  ;;  %1498 = vmatmul.msk.f32.gmra.mxu2 %vm809_vm1, %v999_v33  ;;  %v907_v47 = vand.u32 2147483648, %v2460_v2  ;;  %vm901_vm13 = vweird.f32 %v2460_v2  ;;  %1182 = vmatpush.msrb.mxu1 %v1124_v6 }
 0x284   : > { %v984_v28 = vadd.f32 %v2452_v62, %v983_v20  ;;  %v1587_v31 = vpop.eup %1586  ;;  %v935_v54 = vand.u32 2147483648, %v2467_v7  ;;  %v933_v57 = vand.u32 2147483647, %v2467_v7  ;;  %vm906_vm2 = vcmp.eq.f32.partialorder %v905_v45, 8.507059e+37 }
 0x285   : > { %v890_v22 = vsel %vm889_vm5, %v1581_v56, %v886_v25  ;;  %v914_v38 = vadd.f32 %v1585_v9, %v913_v29  ;;  %v897_v39 = vmul.f32 %v1587_v31, %v2460_v2  ;;  %v1589_v41 = vpop.eup %1588  ;;  %vm902_vm12 = vweird.f32 %v1587_v31  ;;  %v1133_v2 = vld [vmem:[%s2619_s2 + $0x78] sm:$0xff]  ;;  %1183 = vmatpush.msrb.mxu1 %v1123_v12 }
 0x286   : > { %v895_v0 = vsel %vm2474_vm15, %v894_v19, %v890_v22  ;;  %v988_v40 = vsel %vm2505_vm8, %v2452_v62, %v984_v28  ;;  %v925_v37 = vmul.f32 %v1589_v41, %v2467_v7  ;;  %vm930_vm14 = vweird.f32 %v1589_v41  ;;  %vm903_vm15 = vmor %vm901_vm13, %vm902_vm12  ;;  %1239 = vmatpush.msrb.mxu3 %v1133_v2 }
 0x287   : > { %v994_v42 = vmul.f32 %v2387_v11, %v895_v0  ;;  %v918_v43 = vsel %vm917_vm10, %v1585_v9, %v914_v38  ;;  %v898_v44 = vsub.f32 1.0, %v897_v39  ;;  %v993_v48 = vsel %vm2493_vm7, %v992_v35, %v988_v40  ;;  %v1119_v9 = vld [vmem:[%s2619_s2 + $0x8] sm:$0xff]  ;;  %1184 = vmatpush.msrb.mxu1 %v1122_v14 }
 0x288   : > { %v923_v46 = vsel %vm920_vm11, %v922_v3, %v918_v43  ;;  %v926_v50 = vsub.f32 1.0, %v925_v37  ;;  %v1001_v52 = vmul.f32 %v2385_v10, %v993_v48  ;;  %v908_v58 = vor.u32 1.1754944e-38, %v907_v47 }
 0x289   : > { %1493 = vmatmul.msk.f32.vlgmr.msra.gmra.mxu0 %vm809_vm1, %v994_v42  ;;  %v899_v11 = vmul.f32 %v1587_v31, %v898_v44  ;;  %v996_v51 = vmul.f32 %v2383_v8, %v923_v46  ;;  %vm929_vm3 = vweird.f32 %v2467_v7  ;;  %v936_v59 = vor.u32 1.1754944e-38, %v935_v54  ;;  %v1131_v7 = vld [vmem:[%s2619_s2 + $0x68] sm:$0xff] }
 0x28a   : > { %v927_v56 = vmul.f32 %v1589_v41, %v926_v50  ;;  %1500 = vmatmul.msk.f32.gmra.mxu3 %vm809_vm1, %v1001_v52  ;;  %vm931_vm4 = vmor %vm929_vm3, %vm930_vm14  ;;  %vm934_vm5 = vcmp.eq.f32.partialorder %v933_v57, 8.507059e+37 }
 0x28b   : > { %v900_v55 = vadd.f32 %v1587_v31, %v899_v11  ;;  %1495 = vmatmul.msk.f32.vlgmr.msra.gmra.mxu1 %vm809_vm1, %v996_v51 }
 0x28c   : > { %v928_v8 = vadd.f32 %v1589_v41, %v927_v56 }
 0x28d   : > { %v904_v10 = vsel %vm903_vm15, %v1587_v31, %v900_v55 }
 0x28e   : > { %v909_v60 = vsel %vm906_vm2, %v908_v58, %v904_v10  ;;  %v932_v62 = vsel %vm931_vm4, %v1589_v41, %v928_v8 }
 0x28f   : > { %v995_v61 = vmul.f32 %v2395_v15, %v909_v60  ;;  %v937_v63 = vsel %vm934_vm5, %v936_v59, %v932_v62  ;;  %v1121_v15 = vld [vmem:[%s2619_s2 + $0x18] sm:$0xff] }
 0x290   : > { %v997_v53 = vmul.f32 %v2397_v16, %v937_v63  ;;  %1152 = vmatpush.msrb.mxu0 %v1121_v15  ;;  %v1132_v16 = vld [vmem:[%s2619_s2 + $0x70] sm:$0xff] }
 0x291   : > { %1494 = vmatmul.msk.f32.gmra.mxu0 %vm809_vm1, %v995_v61  ;;  %1240 = vmatpush.msrb.mxu3 %v1132_v16 }
 0x292   : > { %1153 = vmatpush.msrb.mxu0 %v1120_v5 }
 0x293   : > { %1496 = vmatmul.msk.f32.gmra.mxu1 %vm809_vm1, %v997_v53  ;;  %1241 = vmatpush.msrb.mxu3 %v1131_v7 }
 0x294   : > { %1154 = vmatpush.msrb.mxu0 %v1119_v9 }
 0x295   : > { %1242 = vmatpush.msrb.mxu3 %v1130_v13 }
 0x296   : > { %1155 = vmatpush.msrb.mxu0 %v1118_v32 }
 0x2fc   : > { %v1083_v49 = vpop.f32.mrf.mxu2 }
 0x2fd   : > { %1505 = vmatmul.msk.f32.vlgmr.msrb.gmra.mxu2 %vm668_vm0, %v1083_v49 }
 0x305   : > { %v1112_v18 = vpop.f32.mrf.mxu3 }
 0x306   : > { %v1025_v17 = vpop.f32.mrf.mxu0  ;;  %1507 = vmatmul.msk.f32.vlgmr.msrb.gmra.mxu3 %vm668_vm0, %v1112_v18  ;;  %v1086_v20 = vpop.f32.mrf.mxu2 }
 0x307   : > { %1501 = vmatmul.msk.f32.vlgmr.msrb.gmra.mxu0 %vm668_vm0, %v1025_v17  ;;  %1506 = vmatmul.msk.f32.gmra.mxu2 %vm668_vm0, %v1086_v20 }
 0x308   : > { %v1054_v19 = vpop.f32.mrf.mxu1 }
 0x309   : > { %1503 = vmatmul.msk.f32.vlgmr.msrb.gmra.mxu1 %vm668_vm0, %v1054_v19 }
 0x30d   : > { %v1115_v23 = vpop.f32.mrf.mxu3 }
 0x30e   : > { %v1028_v21 = vpop.f32.mrf.mxu0  ;;  %1508 = vmatmul.msk.f32.gmra.mxu3 %vm668_vm0, %v1115_v23 }
 0x30f   : > { %1502 = vmatmul.msk.f32.gmra.mxu0 %vm668_vm0, %v1028_v21 }
 0x310   : > { %v1057_v24 = vpop.f32.mrf.mxu1 }
 0x311   : > { %1504 = vmatmul.msk.f32.gmra.mxu1 %vm668_vm0, %v1057_v24 }
 0x380   : > { %v1215_v26 = vpop.f32.mrf.mxu2 }
 0x384   : > { %v1157_v25 = vpop.f32.mrf.mxu0 }
 0x386   : > { %v1186_v27 = vpop.f32.mrf.mxu1 }
 0x387   : > { %v1250_v28 = vadd.f32 %v1186_v27, %v1157_v25 }
 0x389   : > { %v1251_v29 = vadd.f32 %v1250_v28, %v1215_v26  ;;  %v1244_v31 = vpop.f32.mrf.mxu3 }
 0x38a   : > { %v1218_v36 = vpop.f32.mrf.mxu2 }
 0x38b   : > { %v1252_v22 = vadd.f32 %v1251_v29, %v1244_v31 }
 0x38c   : > { %v1160_v34 = vpop.f32.mrf.mxu0 }
 0x38d   : > { %v1260_v35 = vadd.f32 %v1557_v30, %v1252_v22 }
 0x38e   : > { %v1189_v33 = vpop.f32.mrf.mxu1 }
 0x38f   : > { %v1253_v0 = vadd.f32 %v1189_v33, %v1160_v34  ;;  %1262 = vst [vmem:[%s190_s6] sm:$0xff] %v1260_v35 }
 0x391   : > { %v1254_v38 = vadd.f32 %v1253_v0, %v1218_v36  ;;  %v1247_v39 = vpop.f32.mrf.mxu3 }
 0x393   : > { %v1255_v41 = vadd.f32 %v1254_v38, %v1247_v39 }
 0x395   : > { %v1261_v3 = vadd.f32 %v1557_v30, %v1255_v41 }
 0x397   : > { %1263 = vst [vmem:[%s190_s6 + $0x8] sm:$0xff] %v1261_v3 }
 0x398   : > { %1617 = shalt.err (!%p1614_p3)
}
 0x399   : > { %s1654_s22 = smov 128   ;;  %s1655_s23 = smov 8  }
 0x39a   : > { %1516 = dma.vmem_to_hbm [thread:$0]  (%p1719_p5), %s1278_s10, 256, %s1280_s11, %s1265_s19, %s1654_s22, %s1654_s22, %s1655_s23  }
 0x39b PF: > { %p1522_p4 = scmp.ge.s32.totalorder %s1652_s18, 2  ;;  %s1294_s27 = sand.u32 1, %s1640_s15  }
 0x39c   : > { %s1295_s29 = scalar_lea.sflag [#allocation3], %s1294_s27 }
 0x39d   : > { %p1519_p7 = pnand %p1522_p4, %p1723_p6 }
 0x39f   : > { %p1520_p8 = pneg %p1519_p7 }
 0x3a1   : > { %1635 = dma.done.wait (%p1520_p8), %s1295_s29, 256  }
 0x3a2   : > { %1637 = vsyncadd (%p1520_p8), %s1295_s29, 4294967040  ;;  %p14_p9 = scmp.ge.s32.totalorder %s1706_s21, 6   ;;  %s2638_s15 = smov %s1644_s16 }
 0x3a3   : > { %s2639_s16 = smov %s1648_s17  ;;  %s2640_s17 = smov %s1717_s24 }
 0x3a4   : > { %s2641_s18 = smov %s1706_s21  ;;  %16 = sbr.rel (!%p14_p9) target bundleno = 3 (0x3), region = 73 }
 0x3a9   :  { %1301 = vsyncpa [#allocation3], 1 }
 0x3aa   :  { %1303 = vsyncpa [#allocation3 + $0x1], 1 }

</bundles_post_ra>
